<compile_context>
chip_gen: v7x
topology: tpu7x:2x2x1
jax: 0.10.0
libtpu: 0.0.40
codegen_flags: <defaults>
</compile_context>

<pallas_src>
import jax
import jax.numpy as jnp
from jax.experimental import pallas as pl
from jax.experimental.pallas import tpu as pltpu


def value_net_kernel(xt_ref, w1_ref, b1_ref, w2_ref, b2_ref, out_ref):
    # hT = relu(W1 @ x^T + b1)            : (H, TB), batch on the lane axis
    h = jnp.dot(w1_ref[...], xt_ref[...], preferred_element_type=jnp.float32)
    h = jnp.maximum(h + b1_ref[...], 0.0)            # (H, TB) + (H, 1) lane-broadcast
    # value row = w2^T @ hT + b2 as VPU mul + sublane (XLU) reduce -> no 2nd MXU pass
    v = jnp.sum(h * w2_ref[...], axis=0, keepdims=True)      # (1, TB), lane-dense
    out_ref[...] = (v + b2_ref[0, 0]).astype(out_ref.dtype)  # scalar bias from SMEM


def _round_up(n, m):
    return ((n + m - 1) // m) * m


def value_net_forward(x, w1, b1, w2, b2, *, batch_tile=512):
    """x: (B, S) f32; w1: (H, S); b1: (H, 1); w2: (H, 1); b2: (1, 1). Returns (B, 1)."""
    B, S = x.shape
    H = w1.shape[0]

    # Batch tile: multiple of 128 lanes; sized well under the 32 MiB scoped-VMEM
    # default even on v7x (weights + 2x double-buffered (S,TB)/(1,TB) f32 tiles).
    tb = min(batch_tile, _round_up(B, 128))
    bp = _round_up(B, tb)

    # Layout plumbing in the wrapper: batch onto the lane axis (lane-dense in/out).
    xt = x.T                                              # (S, B)
    if bp != B:
        xt = jnp.pad(xt, ((0, 0), (0, bp - B)))           # zero-pad batch to tile

    flops = 2 * bp * H * (S + 1)                          # matmul + mul/reduce
    bytes_accessed = 4 * (bp * (S + 1) + H * (S + 2) + 1)

    # NOTE: inputs kept f32 so results match the f32 reference to 1e-5; casting
    # x/w1 to bf16 before the first dot roughly doubles MXU throughput if the
    # looser tolerance is acceptable.
    out_row = pl.pallas_call(
        value_net_kernel,
        out_shape=jax.ShapeDtypeStruct((1, bp), jnp.float32),
        grid=(bp // tb,),
        in_specs=[
            pl.BlockSpec((S, tb), lambda i: (0, i)),      # x^T: batch-tiled, pipelined
            pl.BlockSpec((H, S), lambda i: (0, 0)),       # W1: VMEM-resident
            pl.BlockSpec((H, 1), lambda i: (0, 0)),       # b1: VMEM-resident
            pl.BlockSpec((H, 1), lambda i: (0, 0)),       # W2 column: VMEM-resident
            pl.BlockSpec(memory_space=pltpu.MemorySpace.SMEM),  # b2 scalar in SMEM
        ],
        out_specs=pl.BlockSpec((1, tb), lambda i: (0, i)),      # lane-dense output row
        compiler_params=pltpu.CompilerParams(
            dimension_semantics=("parallel",)),                 # megacore on v7x
        cost_estimate=pl.CostEstimate(
            flops=flops, transcendentals=0, bytes_accessed=bytes_accessed),
    )(xt, w1, b1, w2, b2)

    return out_row[0, :B].reshape(B, 1)


def init_params(key, state_dim, hidden_dim):
    """Deterministic init mimicking torch.nn.Linear uniform(-1/sqrt(fan_in), 1/sqrt(fan_in))."""
    k1, k2, k3, k4 = jax.random.split(key, 4)
    bound1 = 1.0 / jnp.sqrt(jnp.float32(state_dim))
    bound2 = 1.0 / jnp.sqrt(jnp.float32(hidden_dim))
    w1 = jax.random.uniform(k1, (hidden_dim, state_dim), jnp.float32, -bound1, bound1)
    b1 = jax.random.uniform(k2, (hidden_dim, 1), jnp.float32, -bound1, bound1)
    w2 = jax.random.uniform(k3, (hidden_dim, 1), jnp.float32, -bound2, bound2)
    b2 = jax.random.uniform(k4, (1, 1), jnp.float32, -bound2, bound2)
    return w1, b1, w2, b2


if __name__ == "__main__":
    key = jax.random.PRNGKey(0)
    batch, state_dim, hidden_dim = 8, 16, 32

    k_x, k_p = jax.random.split(key)
    x = jax.random.normal(k_x, (batch, state_dim), jnp.float32)
    w1, b1, w2, b2 = init_params(k_p, state_dim, hidden_dim)

    out = value_net_forward(x, w1, b1, w2, b2)
    out = jax.block_until_ready(out)

    # Pure-JAX reference: relu(x @ W1.T + b1) @ W2 + b2 (PyTorch Linear semantics)
    h_ref = jnp.maximum(x @ w1.T + b1.reshape(1, hidden_dim), 0.0)
    ref = h_ref @ w2 + b2
    assert out.shape == (batch, 1)
    assert jnp.allclose(out, ref, atol=1e-5, rtol=1e-5)

    print("KERNEL_OK")
</pallas_src>

<mosaic_0001>
module attributes {stable_mosaic.version = 11 : i64} {
  func.func @value_net_kernel(%arg0: i32, %arg1: memref<16x128xf32, #tpu.memory_space<vmem>>, %arg2: memref<32x16xf32, #tpu.memory_space<vmem>>, %arg3: memref<32x1xf32, #tpu.memory_space<vmem>>, %arg4: memref<32x1xf32, #tpu.memory_space<vmem>>, %arg5: memref<1x1xf32, #tpu.memory_space<smem>>, %arg6: memref<1x128xf32, #tpu.memory_space<vmem>>) attributes {dimension_semantics = [#tpu.dimension_semantics<parallel>], iteration_bounds = array<i64: 1>, scalar_prefetch = 0 : i64, scratch_operands = 0 : i64, tpu.core_type = #tpu.core_type<tc>, window_params = [{transform_indices = @transform_0, window_bounds = array<i64: 16, 128>}, {pipeline_mode = #tpu.pipeline_mode<synchronous>, transform_indices = @transform_1, window_bounds = array<i64: 32, 16>}, {pipeline_mode = #tpu.pipeline_mode<synchronous>, transform_indices = @transform_2, window_bounds = array<i64: 32, 1>}, {pipeline_mode = #tpu.pipeline_mode<synchronous>, transform_indices = @transform_3, window_bounds = array<i64: 32, 1>}, {transform_indices = @transform_4, window_bounds = array<i64: 1, 1>}, {transform_indices = @transform_5, window_bounds = array<i64: 1, 128>}]} {
    %c0 = arith.constant 0 : index
    %c0_0 = arith.constant 0 : index
    %0 = vector.load %arg2[%c0, %c0_0] : memref<32x16xf32, #tpu.memory_space<vmem>>, vector<32x16xf32>
    %c0_1 = arith.constant 0 : index
    %c0_2 = arith.constant 0 : index
    %1 = vector.load %arg1[%c0_1, %c0_2] : memref<16x128xf32, #tpu.memory_space<vmem>>, vector<16x128xf32>
    %cst = arith.constant dense<0.000000e+00> : vector<32x128xf32>
    %2 = tpu.matmul %0, %1, %cst {dimension_numbers = #tpu.dot_dimension_numbers<[1], [0], [0], [1], [0, 0, 1, 1], [], []>} : vector<32x16xf32>, vector<16x128xf32>, vector<32x128xf32> -> vector<32x128xf32>
    %c0_3 = arith.constant 0 : index
    %c0_4 = arith.constant 0 : index
    %3 = vector.load %arg3[%c0_3, %c0_4] : memref<32x1xf32, #tpu.memory_space<vmem>>, vector<32x1xf32>
    %4 = vector.broadcast %3 : vector<32x1xf32> to vector<32x128xf32>
    %5 = arith.addf %2, %4 : vector<32x128xf32>
    %cst_5 = arith.constant 0.000000e+00 : f32
    %6 = vector.broadcast %cst_5 : f32 to vector<32x128xf32>
    %7 = arith.maximumf %5, %6 : vector<32x128xf32>
    %c0_6 = arith.constant 0 : index
    %c0_7 = arith.constant 0 : index
    %8 = vector.load %arg4[%c0_6, %c0_7] : memref<32x1xf32, #tpu.memory_space<vmem>>, vector<32x1xf32>
    %9 = vector.broadcast %8 : vector<32x1xf32> to vector<32x128xf32>
    %10 = arith.mulf %7, %9 : vector<32x128xf32>
    %cst_8 = arith.constant dense<0.000000e+00> : vector<128xf32>
    %11 = vector.multi_reduction <add>, %10, %cst_8 [0] : vector<32x128xf32> to vector<128xf32>
    %12 = vector.shape_cast %11 : vector<128xf32> to vector<1x128xf32>
    %c0_9 = arith.constant 0 : index
    %c0_10 = arith.constant 0 : index
    %13 = memref.load %arg5[%c0_9, %c0_10] : memref<1x1xf32, #tpu.memory_space<smem>>
    %14 = vector.broadcast %13 : f32 to vector<1x128xf32>
    %15 = arith.addf %12, %14 : vector<1x128xf32>
    %c0_11 = arith.constant 0 : index
    %c0_12 = arith.constant 0 : index
    %16 = vector.load %arg6[%c0_11, %c0_12] : memref<1x128xf32, #tpu.memory_space<vmem>>, vector<1x128xf32>
    tpu.vector_store %arg6[%c0_11, %c0_12], %15 {strides = array<i32>} : memref<1x128xf32, #tpu.memory_space<vmem>>, vector<1x128xf32>,
    return
  }
  func.func @transform_0(%arg0: i32) -> (i32, i32) {
    %c0_i32 = arith.constant 0 : i32
    %c0_i32_0 = arith.constant 0 : i32
    return %c0_i32, %arg0 : i32, i32
  }
  func.func @transform_1(%arg0: i32) -> (i32, i32) {
    %c0_i32 = arith.constant 0 : i32
    %c0_i32_0 = arith.constant 0 : i32
    %c0_i32_1 = arith.constant 0 : i32
    return %c0_i32, %c0_i32_0 : i32, i32
  }
  func.func @transform_2(%arg0: i32) -> (i32, i32) {
    %c0_i32 = arith.constant 0 : i32
    %c0_i32_0 = arith.constant 0 : i32
    %c0_i32_1 = arith.constant 0 : i32
    return %c0_i32, %c0_i32_0 : i32, i32
  }
  func.func @transform_3(%arg0: i32) -> (i32, i32) {
    %c0_i32 = arith.constant 0 : i32
    %c0_i32_0 = arith.constant 0 : i32
    %c0_i32_1 = arith.constant 0 : i32
    return %c0_i32, %c0_i32_0 : i32, i32
  }
  func.func @transform_4(%arg0: i32) -> (i32, i32) {
    %c0_i32 = arith.constant 0 : i32
    %c0_i32_0 = arith.constant 0 : i32
    %c0_i32_1 = arith.constant 0 : i32
    return %c0_i32, %c0_i32_0 : i32, i32
  }
  func.func @transform_5(%arg0: i32) -> (i32, i32) {
    %c0_i32 = arith.constant 0 : i32
    %c0_i32_0 = arith.constant 0 : i32
    return %c0_i32, %arg0 : i32, i32
  }
}

</mosaic_0001>

<bundles_post_ra>
// kernel: tpu_custom_call.1
= control target key start
LH: loop header
LB: loop body
LE: loop exit
PB: predicated region body
PF: predicated region fallthrough
CT: control target
= control target key end

     0   :  { %vm52_vm0 = vcmask 130048   ;;  %v263_v5 = vmov 0   ;;  %s356_s0 = inlined_call_operand.vmem [shape: f32[16,128], index: 0, kind: input, shape index: {}]   ;;  %s357_s1 = inlined_call_operand.vmem [shape: f32[32,16], index: 1, kind: input, shape index: {}]   ;;  %s358_s2 = inlined_call_operand.vmem [shape: f32[32,1], index: 2, kind: input, shape index: {}]   ;;  %s359_s3 = inlined_call_operand.vmem [shape: f32[32,1], index: 3, kind: input, shape index: {}]   ;;  %s360_s4 = inlined_call_operand.<no memory space> [shape: f32[1,1], index: 4, kind: input, shape index: {}]   ;;  %s361_s5 = inlined_call_operand.hbm [shape: f32[1,128], index: 5, kind: output, shape index: {}]  }
   0x1   :  { %v26_v0 = vld [vmem:[%s356_s0] sm:$0xff]  ;;  %v27_v1 = vld [vmem:[%s356_s0 + $0x8] sm:$0xff]  ;;  %v24_v4 = vld [vmem:[%s357_s1 + $0x10] sm:$0xff]  ;;  %237 = vset.pattern.permute.xlu0 %v263_v5  ;;  %238 = vset.pattern.permute.xlu1 %v263_v5 }
   0x2   :  { %v22_v2 = vld [vmem:[%s357_s1] sm:$0xff]  ;;  %v229_v3 = vpack.c.bf16 %v27_v1, %v26_v0  ;;  %226 = vmatprep.mubr.msk.f32.mxu1 %vm52_vm0, %v24_v4  ;;  %v30_v7 = vld [vmem:[%s358_s2 + $0x10] sm:$0xff]  ;;  %v23_v8 = vld [vmem:[%s357_s1 + $0x8] sm:$0xff] }
   0x3   :  { %223 = vmatprep.mubr.msk.f32.mxu0 %vm52_vm0, %v22_v2  ;;  %v28_v6 = vld [vmem:[%s358_s2] sm:$0xff]  ;;  %v25_v9 = vld [vmem:[%s357_s1 + $0x18] sm:$0xff] }
   0x4   :  { %230 = vmatprep.subr.bf16.mxu0 %v229_v3  ;;  %233 = vmatprep.subr.bf16.mxu1 %v229_v3 }
   0x5   :  { %232 = vmatpush3.bf16.msra.mxu0 %v229_v3  ;;  %234 = vmatpush3.bf16.msra.mxu1 %v229_v3 }
   0x6   :  { %11 = vsyncpa [#allocation4], 0  ;;  %34 = vperm.xlu0 %237, %v28_v6   ;;  %44 = vperm.xlu1 %238, %v30_v7   ;;  %v29_v10 = vld [vmem:[%s358_s2 + $0x8] sm:$0xff]  ;;  %v31_v11 = vld [vmem:[%s358_s2 + $0x18] sm:$0xff]  ;;  %v192_v48 = vstv %s360_s4  ;;  %s264_s19 = smov [#allocation3]  }
   0x7   :  { %v154_v12 = vld [vmem:[%s359_s3] sm:$0xff]  ;;  %v155_v13 = vld [vmem:[%s359_s3 + $0x8] sm:$0xff]  ;;  %v156_v14 = vld [vmem:[%s359_s3 + $0x10] sm:$0xff]  ;;  %s201_s20 = sshll.u32 %s264_s19, 4  ;;  %s202_s20 = int_to_ptr.vmem [resolvable:$true] %s201_s20 }
   0x8   :  { %224 = vmatmul.mubr.msk.f32.vlgmr.msra.gmra.mrb[0].mxu0 %vm52_vm0, %v23_v8  ;;  %227 = vmatmul.mubr.msk.f32.vlgmr.msra.gmra.mrb[0].mxu1 %vm52_vm0, %v25_v9  ;;  %v157_v15 = vld [vmem:[%s359_s3 + $0x18] sm:$0xff]  ;;  %s239_s21 = scalar_lea.vmem %s202_s20, 16  ;;  %s243_s22 = scalar_lea.vmem %s202_s20, 32 }
   0x9   :  { %p240_p0 = scmp.ne.s32.totalorder %s202_s20, %s239_s21  ;;  %p244_p1 = scmp.lt.s32.totalorder %s202_s20, %s202_s20 }
   0xa   :  { %39 = vperm.xlu0 %237, %v29_v10   ;;  %49 = vperm.xlu1 %238, %v31_v11   ;;  %p245_p2 = scmp.lt.s32.totalorder %s243_s22, %s239_s21 }
   0xc   :  { %p246_p3 = por %p245_p2, %p244_p1 }
   0xe   :  { %160 = vperm.xlu0 %237, %v154_v12   ;;  %165 = vperm.xlu1 %238, %v155_v13   ;;  %p247_p4 = pnand %p246_p3, %p240_p0 }
  0x12   :  { %170 = vperm.xlu0 %237, %v156_v14   ;;  %175 = vperm.xlu1 %238, %v157_v15  }
  0x85   :  { %v35_v16 = vpop.permute.xlu0 %34  ;;  %v45_v17 = vpop.permute.xlu1 %44 }
  0x89   :  { %v40_v18 = vpop.permute.xlu0 %39  ;;  %v50_v19 = vpop.permute.xlu1 %49 }
  0x8d   :  { %v161_v20 = vpop.permute.xlu0 %160  ;;  %v166_v29 = vpop.permute.xlu1 %165 }
  0x91   :  { %v171_v36 = vpop.permute.xlu0 %170  ;;  %v176_v39 = vpop.permute.xlu1 %175 }
  0xdb   :  { %v225_v21 = vpop.f32.mrb[0].mxu0  ;;  %v228_v22 = vpop.f32.mrb[0].mxu1 }
  0xdc   :  { %v137_v23 = vadd.f32 %v225_v21, %v40_v18  ;;  %v131_v24 = vpop.f32.mrb[1].mxu0  ;;  %v141_v25 = vpop.f32.mrb[1].mxu1  ;;  %v147_v26 = vadd.f32 %v228_v22, %v50_v19 }
  0xdd   :  { %v132_v27 = vadd.f32 %v131_v24, %v35_v16  ;;  %v142_v28 = vadd.f32 %v141_v25, %v45_v17 }
  0xde   :  { %v151_v30 = vmax.f32 %v137_v23, 0.0  ;;  %v153_v34 = vmax.f32 %v147_v26, 0.0 }
  0xdf   :  { %v150_v31 = vmax.f32 %v132_v27, 0.0  ;;  %v152_v32 = vmax.f32 %v142_v28, 0.0 }
  0xe0   :  { %v179_v33 = vmul.f32 %v166_v29, %v151_v30  ;;  %v181_v40 = vmul.f32 %v176_v39, %v153_v34 }
  0xe1   :  { %v178_v35 = vmul.f32 %v161_v20, %v150_v31  ;;  %v180_v38 = vmul.f32 %v171_v36, %v152_v32 }
  0xe3   :  { %v182_v37 = vadd.f32 %v179_v33, %v178_v35 }
  0xe5   :  { %v183_v41 = vadd.f32 %v182_v37, %v180_v38 }
  0xe7   :  { %v184_v42 = vadd.f32 %v183_v41, %v181_v40 }
  0xe9   :  { %v185_v43 = vrot.slane %v184_v42, 4 }
  0xeb   :  { %v186_v44 = vadd.f32 %v185_v43, %v184_v42 }
  0xed   :  { %v187_v45 = vrot.slane %v186_v44, 2 }
  0xef   :  { %v188_v46 = vadd.f32 %v187_v45, %v186_v44 }
  0xf1   :  { %v189_v47 = vrot.slane %v188_v46, 1 }
  0xf3   :  { %v190_v49 = vadd.f32 %v189_v47, %v188_v46 }
  0xf5   :  { %v193_v50 = vadd.f32 %v192_v48, %v190_v49 }
  0xf7   :  { %194 = vst [vmem:[#allocation3] sm:$0x1] %v193_v50 }
  0xf8   :  { %250 = shalt.err (!%p247_p4)
}
  0xf9   :  { %s251_s25 = scalar_lea.hbm %s361_s5, 16 }
  0xfa   :  { %p252_p5 = scmp.ne.s32.totalorder %s361_s5, %s251_s25  ;;  %p255_p6 = scmp.lt.u32.totalorder %s251_s25, %s361_s5 }
  0xfc   :  { %p257_p7 = pnand %p255_p6, %p252_p5 }
  0xfe   :  { %260 = shalt.err (!%p257_p7)
}
  0xff   :  { %204 = dma.vmem_to_hbm [thread:$0]  %s202_s20, 16, %s361_s5, [#allocation4]  }
 0x100   :  { %261 = dma.done.wait [#allocation4], 16  }
 0x101   :  { %262 = vsyncadd [#allocation4], 4294967280 }
 0x102   :  { %208 = vsyncpa [#allocation4], 1 }

</bundles_post_ra>
